<compile_context>
chip_gen: v7x
topology: tpu7x:2x2x1
jax: 0.10.0
libtpu: 0.0.40
codegen_flags: <defaults>
</compile_context>

<pallas_src>
import jax
import jax.numpy as jnp
import numpy as np
from typing import NamedTuple
from jax.experimental import pallas as pl
from jax.experimental.pallas import tpu as pltpu

LANE = 128          # vreg lane width
SUBLANE = 8         # vreg sublane height
SMALL_BATCH_MAX = 64  # below this, fused XLA beats pallas_call fixed cost


def _round_up(x, m):
    return ((x + m - 1) // m) * m


class DQNParams(NamedTuple):
    """Lane-padded parameters. Pad once (init time), reuse every step."""
    w1p: jax.Array  # (S, Hp)
    b1p: jax.Array  # (1, Hp)
    w2p: jax.Array  # (Hp, Ap)
    b2p: jax.Array  # (1, Ap)


def pad_dqn_params(w1, b1, w2, b2) -> DQNParams:
    """Zero-pad hidden/action dims to 128 lanes.  Numerically exact:
    ReLU(0 + 0) = 0 and zero rows of W2 contribute nothing; padded action
    lanes are sliced off after the kernel."""
    S, H = w1.shape
    A = w2.shape[1]
    Hp = _round_up(H, LANE)
    Ap = _round_up(A, LANE)
    f32 = jnp.float32
    w1p = jnp.zeros((S, Hp), f32).at[:, :H].set(w1.astype(f32))
    b1p = jnp.zeros((1, Hp), f32).at[:, :H].set(jnp.reshape(b1, (1, -1)).astype(f32))
    w2p = jnp.zeros((Hp, Ap), f32).at[:H, :A].set(w2.astype(f32))
    b2p = jnp.zeros((1, Ap), f32).at[:, :A].set(jnp.reshape(b2, (1, -1)).astype(f32))
    return DQNParams(w1p, b1p, w2p, b2p)


def dqn_kernel(x_ref, w1_ref, b1_ref, w2_ref, b2_ref, o_ref):
    # Layer 1: x @ W1 + b1, ReLU  (MXU matmul, VPU add/max)
    h = jnp.dot(x_ref[...], w1_ref[...], preferred_element_type=jnp.float32)
    h = jnp.maximum(h + b1_ref[...], 0.0)          # b1 is (1, Hp) -> broadcast
    # Layer 2: h @ W2 + b2
    out = jnp.dot(h, w2_ref[...], preferred_element_type=jnp.float32)
    o_ref[...] = (out + b2_ref[...]).astype(o_ref.dtype)


def _pick_batch_tile(B: int) -> int:
    # Small batches: a single sublane-aligned tile (one grid step).
    if B <= 2 * LANE:
        return _round_up(B, SUBLANE)
    # Large batches: big tiles (up to 1024 rows) amortize the ~0.35 us/step grid
    # overhead, but keep >= 4 tiles so the "parallel" batch axis can still be
    # megacore-sharded across v7x's 2 TensorCores.
    tb = _round_up(-(-B // 4), SUBLANE)
    return max(LANE, min(tb, 1024))


def dqn_forward_pallas(x, params: DQNParams, *, hidden_size: int, action_size: int):
    """Pallas forward: ReLU(x @ w1 + b1) @ w2 + b2 with lane-padded params."""
    B, S = x.shape
    Hp = params.w1p.shape[1]
    Ap = params.w2p.shape[1]

    TB = _pick_batch_tile(B)
    grid = (pl.cdiv(B, TB),)          # ragged tail tile: OOB rows masked on store

    out = pl.pallas_call(
        dqn_kernel,
        out_shape=jax.ShapeDtypeStruct((B, Ap), jnp.float32),
        grid=grid,
        in_specs=[
            pl.BlockSpec((TB, S),  lambda i: (i, 0)),   # activations: tiled over batch
            pl.BlockSpec((S, Hp),  lambda i: (0, 0)),   # weights/biases: VMEM-resident
            pl.BlockSpec((1, Hp),  lambda i: (0, 0)),
            pl.BlockSpec((Hp, Ap), lambda i: (0, 0)),
            pl.BlockSpec((1, Ap),  lambda i: (0, 0)),
        ],
        out_specs=pl.BlockSpec((TB, Ap), lambda i: (i, 0)),
        compiler_params=pltpu.CompilerParams(
            dimension_semantics=("parallel",),           # megacore-shard batch tiles (v7x)
        ),
        cost_estimate=pl.CostEstimate(                   # true (unpadded) cost
            flops=2 * B * (S * hidden_size + hidden_size * action_size),
            transcendentals=0,
            bytes_accessed=4 * (B * S + S * hidden_size + hidden_size
                                + hidden_size * action_size + action_size
                                + B * action_size),
        ),
    )(x.astype(jnp.float32), params.w1p, params.b1p, params.w2p, params.b2p)

    # Only the lane padding remains to drop; rows are already exact.
    return out[:, :action_size]


def _dqn_forward_xla(x, params: DQNParams, action_size: int):
    # Online/action-selection path (tiny batches): fused XLA, no pallas_call overhead.
    h = jnp.maximum(x.astype(jnp.float32) @ params.w1p + params.b1p, 0.0)
    return (h @ params.w2p + params.b2p)[:, :action_size]


def dqn_forward(x, params: DQNParams, *, hidden_size: int, action_size: int):
    """Dispatch: fused XLA for tiny (online) batches, Pallas for replay-sized batches."""
    if x.shape[0] <= SMALL_BATCH_MAX:                    # static at trace time
        return _dqn_forward_xla(x, params, action_size)
    return dqn_forward_pallas(x, params, hidden_size=hidden_size, action_size=action_size)


def init_linear_params(key, in_features, out_features):
    """Deterministic init mimicking torch.nn.Linear default (uniform +/- 1/sqrt(in)).
    Stored as (in, out) so the forward is x @ W (== x @ W_pt.T)."""
    k_w, k_b = jax.random.split(key)
    bound = 1.0 / np.sqrt(in_features)
    w = jax.random.uniform(k_w, (in_features, out_features), jnp.float32, -bound, bound)
    b = jax.random.uniform(k_b, (1, out_features), jnp.float32, -bound, bound)
    return w, b


def reference_forward(x, w1, b1, w2, b2):
    h = jnp.maximum(x @ w1 + b1, 0.0)
    return h @ w2 + b2


if __name__ == "__main__":
    state_size = 16
    action_size = 4
    hidden_size = 50   # module default

    key = jax.random.PRNGKey(0)
    k_x, k_l1, k_l2 = jax.random.split(key, 3)

    w1, b1 = init_linear_params(k_l1, state_size, hidden_size)
    w2, b2 = init_linear_params(k_l2, hidden_size, action_size)

    # Pad once, outside the per-step hot path.
    params = pad_dqn_params(w1, b1, w2, b2)

    fwd = jax.jit(dqn_forward, static_argnames=("hidden_size", "action_size"))
    fwd_pallas = jax.jit(dqn_forward_pallas, static_argnames=("hidden_size", "action_size"))

    # 1) Small batch through the Pallas kernel directly (single 8-row tile).
    x_small = jax.random.normal(k_x, (8, state_size), jnp.float32)
    out_small = fwd_pallas(x_small, params, hidden_size=hidden_size, action_size=action_size)
    jax.block_until_ready(out_small)
    ref_small = reference_forward(x_small, w1, b1, w2, b2)
    np.testing.assert_allclose(np.asarray(out_small), np.asarray(ref_small), rtol=1e-5, atol=1e-5)

    # 2) Same batch through the dispatcher (exercises the fused-XLA online path).
    out_disp = fwd(x_small, params, hidden_size=hidden_size, action_size=action_size)
    np.testing.assert_allclose(np.asarray(out_disp), np.asarray(ref_small), rtol=1e-5, atol=1e-5)

    # 3) Replay-buffer batch: 500 rows -> 4 tiles of 128 with a ragged, masked tail.
    x_big = jax.random.normal(k_x, (500, state_size), jnp.float32)
    out_big = fwd(x_big, params, hidden_size=hidden_size, action_size=action_size)
    jax.block_until_ready(out_big)
    ref_big = reference_forward(x_big, w1, b1, w2, b2)
    np.testing.assert_allclose(np.asarray(out_big), np.asarray(ref_big), rtol=1e-5, atol=1e-5)

    print("KERNEL_OK")
</pallas_src>

<mosaic_0001>
module attributes {stable_mosaic.version = 11 : i64} {
  func.func @dqn_kernel(%arg0: i32, %arg1: memref<8x16xf32, #tpu.memory_space<vmem>>, %arg2: memref<16x128xf32, #tpu.memory_space<vmem>>, %arg3: memref<1x128xf32, #tpu.memory_space<vmem>>, %arg4: memref<128x128xf32, #tpu.memory_space<vmem>>, %arg5: memref<1x128xf32, #tpu.memory_space<vmem>>, %arg6: memref<8x128xf32, #tpu.memory_space<vmem>>) attributes {dimension_semantics = [#tpu.dimension_semantics<parallel>], iteration_bounds = array<i64: 1>, scalar_prefetch = 0 : i64, scratch_operands = 0 : i64, tpu.core_type = #tpu.core_type<tc>, window_params = [{transform_indices = @transform_0, window_bounds = array<i64: 8, 16>}, {pipeline_mode = #tpu.pipeline_mode<synchronous>, transform_indices = @transform_1, window_bounds = array<i64: 16, 128>}, {pipeline_mode = #tpu.pipeline_mode<synchronous>, transform_indices = @transform_2, window_bounds = array<i64: 1, 128>}, {pipeline_mode = #tpu.pipeline_mode<synchronous>, transform_indices = @transform_3, window_bounds = array<i64: 128, 128>}, {pipeline_mode = #tpu.pipeline_mode<synchronous>, transform_indices = @transform_4, window_bounds = array<i64: 1, 128>}, {transform_indices = @transform_5, window_bounds = array<i64: 8, 128>}]} {
    %c0 = arith.constant 0 : index
    %c0_0 = arith.constant 0 : index
    %0 = vector.load %arg1[%c0, %c0_0] : memref<8x16xf32, #tpu.memory_space<vmem>>, vector<8x16xf32>
    %c0_1 = arith.constant 0 : index
    %c0_2 = arith.constant 0 : index
    %1 = vector.load %arg2[%c0_1, %c0_2] : memref<16x128xf32, #tpu.memory_space<vmem>>, vector<16x128xf32>
    %cst = arith.constant dense<0.000000e+00> : vector<8x128xf32>
    %2 = tpu.matmul %0, %1, %cst {dimension_numbers = #tpu.dot_dimension_numbers<[1], [0], [0], [1], [0, 0, 1, 1], [], []>} : vector<8x16xf32>, vector<16x128xf32>, vector<8x128xf32> -> vector<8x128xf32>
    %c0_3 = arith.constant 0 : index
    %c0_4 = arith.constant 0 : index
    %3 = vector.load %arg3[%c0_3, %c0_4] : memref<1x128xf32, #tpu.memory_space<vmem>>, vector<1x128xf32>
    %4 = vector.broadcast %3 : vector<1x128xf32> to vector<8x128xf32>
    %5 = arith.addf %2, %4 : vector<8x128xf32>
    %cst_5 = arith.constant 0.000000e+00 : f32
    %6 = vector.broadcast %cst_5 : f32 to vector<8x128xf32>
    %7 = arith.maximumf %5, %6 : vector<8x128xf32>
    %c0_6 = arith.constant 0 : index
    %c0_7 = arith.constant 0 : index
    %8 = vector.load %arg4[%c0_6, %c0_7] : memref<128x128xf32, #tpu.memory_space<vmem>>, vector<128x128xf32>
    %cst_8 = arith.constant dense<0.000000e+00> : vector<8x128xf32>
    %9 = tpu.matmul %7, %8, %cst_8 {dimension_numbers = #tpu.dot_dimension_numbers<[1], [0], [0], [1], [0, 0, 1, 1], [], []>} : vector<8x128xf32>, vector<128x128xf32>, vector<8x128xf32> -> vector<8x128xf32>
    %c0_9 = arith.constant 0 : index
    %c0_10 = arith.constant 0 : index
    %10 = vector.load %arg5[%c0_9, %c0_10] : memref<1x128xf32, #tpu.memory_space<vmem>>, vector<1x128xf32>
    %11 = vector.broadcast %10 : vector<1x128xf32> to vector<8x128xf32>
    %12 = arith.addf %9, %11 : vector<8x128xf32>
    %c0_11 = arith.constant 0 : index
    %c0_12 = arith.constant 0 : index
    %13 = vector.load %arg6[%c0_11, %c0_12] : memref<8x128xf32, #tpu.memory_space<vmem>>, vector<8x128xf32>
    tpu.vector_store %arg6[%c0_11, %c0_12], %12 {strides = array<i32>} : memref<8x128xf32, #tpu.memory_space<vmem>>, vector<8x128xf32>,
    return
  }
  func.func @transform_0(%arg0: i32) -> (i32, i32) {
    %c0_i32 = arith.constant 0 : i32
    %c0_i32_0 = arith.constant 0 : i32
    return %arg0, %c0_i32 : i32, i32
  }
  func.func @transform_1(%arg0: i32) -> (i32, i32) {
    %c0_i32 = arith.constant 0 : i32
    %c0_i32_0 = arith.constant 0 : i32
    %c0_i32_1 = arith.constant 0 : i32
    return %c0_i32, %c0_i32_0 : i32, i32
  }
  func.func @transform_2(%arg0: i32) -> (i32, i32) {
    %c0_i32 = arith.constant 0 : i32
    %c0_i32_0 = arith.constant 0 : i32
    %c0_i32_1 = arith.constant 0 : i32
    return %c0_i32, %c0_i32_0 : i32, i32
  }
  func.func @transform_3(%arg0: i32) -> (i32, i32) {
    %c0_i32 = arith.constant 0 : i32
    %c0_i32_0 = arith.constant 0 : i32
    %c0_i32_1 = arith.constant 0 : i32
    return %c0_i32, %c0_i32_0 : i32, i32
  }
  func.func @transform_4(%arg0: i32) -> (i32, i32) {
    %c0_i32 = arith.constant 0 : i32
    %c0_i32_0 = arith.constant 0 : i32
    %c0_i32_1 = arith.constant 0 : i32
    return %c0_i32, %c0_i32_0 : i32, i32
  }
  func.func @transform_5(%arg0: i32) -> (i32, i32) {
    %c0_i32 = arith.constant 0 : i32
    %c0_i32_0 = arith.constant 0 : i32
    return %arg0, %c0_i32 : i32, i32
  }
}

</mosaic_0001>

<bundles_post_ra>
// kernel: dqn_forward_pallas.1
= control target key start
LH: loop header
LB: loop body
LE: loop exit
PB: predicated region body
PF: predicated region fallthrough
CT: control target
= control target key end

     0   :  { %10 = vsyncpa [#allocation3], 0  ;;  %s503_s0 = inlined_call_operand.hbm [shape: f32[8,16], index: 0, kind: input, shape index: {}]   ;;  %s504_s1 = inlined_call_operand.hbm [shape: f32[16,128], index: 1, kind: input, shape index: {}]   ;;  %s505_s2 = inlined_call_operand.vmem [shape: f32[1,128], index: 2, kind: input, shape index: {}]   ;;  %s506_s3 = inlined_call_operand.hbm [shape: f32[128,128], index: 3, kind: input, shape index: {}]   ;;  %s507_s4 = inlined_call_operand.vmem [shape: f32[1,128], index: 4, kind: input, shape index: {}]   ;;  %s508_s5 = inlined_call_operand.vmem [shape: f32[8,128], index: 5, kind: output, shape index: {}]  }
   0x1   :  { %11 = vsyncpa [#allocation5], 0  ;;  %s414_s18 = smov [#allocation4]   ;;  %s344_s22 = scalar_lea.hbm %s504_s1, 256 }
   0x2   :  { %s27_s19 = sshll.u32 %s414_s18, 4  ;;  %p345_p0 = scmp.ne.s32.totalorder %s504_s1, %s344_s22  ;;  %s28_s19 = int_to_ptr.vmem [resolvable:$true] %s27_s19 }
   0x3   :  { %p348_p1 = scmp.lt.u32.totalorder %s344_s22, %s504_s1 }
   0x5   :  { %p350_p2 = pnand %p348_p1, %p345_p0 }
   0x7   :  { %353 = shalt.err (!%p350_p2)
}
   0x8   :  { %s354_s27 = scalar_lea.vmem %s28_s19, 256  ;;  %p359_p4 = scmp.lt.s32.totalorder %s28_s19, %s28_s19 }
   0x9   :  { %p355_p3 = scmp.ne.s32.totalorder %s28_s19, %s354_s27  ;;  %p360_p5 = scmp.lt.s32.totalorder %s354_s27, %s354_s27 }
   0xb   :  { %p361_p6 = por %p360_p5, %p359_p4 }
   0xd   :  { %p362_p7 = pnand %p361_p6, %p355_p3 }
   0xf   :  { %365 = shalt.err (!%p362_p7)
}
  0x10   :  { %s415_s28 = smov 128   ;;  %s416_s29 = smov 8  }
  0x11   :  { %33 = dma.hbm_to_vmem [thread:$0]  %s504_s1, 256, %s28_s19, [#allocation5], %s415_s28, %s415_s28, %s416_s29  }
  0x12   :  { %s417_s7 = smov [#allocation2]   ;;  %s418_s9 = smov [#allocation6]  }
  0x13   :  { %s18_s8 = sshll.u32 %s417_s7, 4  ;;  %s41_s10 = sshll.u32 %s418_s9, 4  ;;  %s19_s8 = int_to_ptr.vmem [resolvable:$true] %s18_s8  ;;  %s42_s10 = int_to_ptr.vmem [resolvable:$true] %s41_s10 }
  0x14   :  { %s366_s13 = scalar_lea.hbm %s503_s0, 128 }
  0x15   :  { %p367_p8 = scmp.ne.s32.totalorder %s503_s0, %s366_s13  ;;  %p370_p9 = scmp.lt.u32.totalorder %s366_s13, %s503_s0 }
  0x17   :  { %p372_p10 = pnand %p370_p9, %p367_p8 }
  0x19   :  { %375 = shalt.err (!%p372_p10)
}
  0x1a   :  { %s376_s1 = scalar_lea.vmem %s19_s8, 128  ;;  %p381_p12 = scmp.lt.s32.totalorder %s19_s8, %s19_s8 }
  0x1b   :  { %p377_p11 = scmp.ne.s32.totalorder %s19_s8, %s376_s1  ;;  %p382_p13 = scmp.lt.s32.totalorder %s376_s1, %s376_s1 }
  0x1d   :  { %p383_p0 = por %p382_p13, %p381_p12 }
  0x1f   :  { %p384_p1 = pnand %p383_p0, %p377_p11 }
  0x21   :  { %387 = shalt.err (!%p384_p1)
}
  0x22   :  { %21 = dma.hbm_to_vmem [thread:$0]  %s503_s0, 128, %s19_s8, [#allocation3]  }
  0x23   :  { %s388_s22 = scalar_lea.hbm %s506_s3, 2048 }
  0x24   :  { %p389_p2 = scmp.ne.s32.totalorder %s506_s3, %s388_s22  ;;  %p392_p3 = scmp.lt.u32.totalorder %s388_s22, %s506_s3 }
  0x26   :  { %p394_p4 = pnand %p392_p3, %p389_p2 }
  0x28   :  { %397 = shalt.err (!%p394_p4)
}
  0x29   :  { %s398_s27 = scalar_lea.vmem %s42_s10, 2048  ;;  %p403_p6 = scmp.lt.s32.totalorder %s42_s10, %s42_s10 }
  0x2a   :  { %p399_p5 = scmp.ne.s32.totalorder %s42_s10, %s398_s27  ;;  %p404_p7 = scmp.lt.s32.totalorder %s398_s27, %s398_s27 }
  0x2c   :  { %p405_p8 = por %p404_p7, %p403_p6 }
  0x2e   :  { %p406_p9 = pnand %p405_p8, %p399_p5 }
  0x30   :  { %409 = shalt.err (!%p406_p9)
}
  0x31   :  { %47 = dma.hbm_to_vmem [thread:$0]  %s506_s3, 2048, %s42_s10, [#allocation5], %s415_s28, %s415_s28, %s416_s29  }
  0x32   :  { %410 = dma.done.wait [#allocation3], 128  }
  0x33   :  { %411 = vsyncadd [#allocation3], 4294967168 }
  0x34   :  { %412 = dma.done.wait [#allocation5], 2304  }
  0x35   :  { %413 = vsyncadd [#allocation5], 4294964992  ;;  %v419_v0 = vmov 0.0|0.0   ;;  %vm420_vm0 = vmmov 0   ;;  %v421_v1 = vmov 0.0   ;;  %v60_v2 = vld [vmem:[#allocation4] sm:$0xff] }
  0x36   :  { %309 = vmatprep.subr.bf16.mxu0 %v419_v0  ;;  %271 = vmatprep.mubr.msk.f32.mxu0 %vm420_vm0, %v421_v1  ;;  %v61_v3 = vld [vmem:[#allocation4 + $0x8] sm:$0xff]  ;;  %v144_v5 = vld [vmem:[#allocation6] sm:$0xff]  ;;  %v145_v6 = vld [vmem:[#allocation6 + $0x8] sm:$0xff]  ;;  %vm69_vm1 = vcmask 130048  }
  0x37   :  { %312 = vmatprep.subr.bf16.mxu1 %v419_v0  ;;  %306 = vmatprep.mubr.msk.f32.mxu1 %vm420_vm0, %v421_v1  ;;  %v310_v4 = vpack.c.bf16 %v61_v3, %v60_v2  ;;  %v146_v7 = vld [vmem:[#allocation6 + $0x10] sm:$0xff]  ;;  %v313_v8 = vpack.c.bf16 %v145_v6, %v144_v5  ;;  %v147_v9 = vld [vmem:[#allocation6 + $0x18] sm:$0xff]  ;;  %v59_v10 = vld [vmem:[#allocation2] sm:$0xff] }
  0x38   :  { %v316_v11 = vpack.c.bf16 %v147_v9, %v146_v7  ;;  %v148_v12 = vld [vmem:[#allocation6 + $0x20] sm:$0xff]  ;;  %v149_v13 = vld [vmem:[#allocation6 + $0x28] sm:$0xff]  ;;  %v150_v15 = vld [vmem:[#allocation6 + $0x30] sm:$0xff] }
  0x39   :  { %311 = vmatpush3.bf16.msra.mxu0 %v310_v4  ;;  %314 = vmatpush3.bf16.msra.mxu1 %v313_v8  ;;  %v319_v14 = vpack.c.bf16 %v149_v13, %v148_v12  ;;  %v151_v16 = vld [vmem:[#allocation6 + $0x38] sm:$0xff]  ;;  %v152_v18 = vld [vmem:[#allocation6 + $0x40] sm:$0xff]  ;;  %v153_v19 = vld [vmem:[#allocation6 + $0x48] sm:$0xff] }
  0x3a   :  { %315 = vmatprep.subr.bf16.mxu1 %v419_v0  ;;  %v322_v17 = vpack.c.bf16 %v151_v16, %v150_v15  ;;  %v325_v20 = vpack.c.bf16 %v153_v19, %v152_v18  ;;  %v154_v21 = vld [vmem:[#allocation6 + $0x50] sm:$0xff]  ;;  %v155_v22 = vld [vmem:[#allocation6 + $0x58] sm:$0xff]  ;;  %v156_v24 = vld [vmem:[#allocation6 + $0x60] sm:$0xff] }
  0x3b   :  { %v328_v23 = vpack.c.bf16 %v155_v22, %v154_v21  ;;  %v157_v25 = vld [vmem:[#allocation6 + $0x68] sm:$0xff]  ;;  %v158_v27 = vld [vmem:[#allocation6 + $0x70] sm:$0xff]  ;;  %v159_v28 = vld [vmem:[#allocation6 + $0x78] sm:$0xff] }
  0x3c   :  { %272 = vmatmul.mubr.msk.f32.vlgmr.msra.gmra.mrb[0].mxu0 %vm69_vm1, %v59_v10  ;;  %v331_v26 = vpack.c.bf16 %v157_v25, %v156_v24  ;;  %v334_v29 = vpack.c.bf16 %v159_v28, %v158_v27  ;;  %v244_v30 = vld [vmem:[%s505_s2] ss:$0 sm:$0xff] }
  0x3d   :  { %317 = vmatpush3.bf16.msra.mxu1 %v316_v11  ;;  %v246_v35 = vld [vmem:[%s507_s4] ss:$0 sm:$0xff] }
  0x3e   :  { %318 = vmatprep.subr.bf16.mxu1 %v419_v0 }
  0x41   :  { %320 = vmatpush3.bf16.msra.mxu1 %v319_v14 }
  0x42   :  { %321 = vmatprep.subr.bf16.mxu1 %v419_v0 }
  0x45   :  { %323 = vmatpush3.bf16.msra.mxu1 %v322_v17 }
  0x46   :  { %324 = vmatprep.subr.bf16.mxu1 %v419_v0 }
  0x49   :  { %326 = vmatpush3.bf16.msra.mxu1 %v325_v20 }
  0x4a   :  { %327 = vmatprep.subr.bf16.mxu1 %v419_v0 }
  0x4d   :  { %329 = vmatpush3.bf16.msra.mxu1 %v328_v23 }
  0x4e   :  { %330 = vmatprep.subr.bf16.mxu1 %v419_v0 }
  0x51   :  { %332 = vmatpush3.bf16.msra.mxu1 %v331_v26 }
  0x52   :  { %333 = vmatprep.subr.bf16.mxu1 %v419_v0 }
  0x55   :  { %335 = vmatpush3.bf16.msra.mxu1 %v334_v29 }
 0x10f   :  { %v139_v31 = vpop.f32.mrb[0].mxu0 }
 0x110   :  { %v140_v32 = vadd.f32 %v244_v30, %v139_v31  ;;  %v273_v33 = vpop.f32.mrb[1].mxu0 }
 0x112   :  { %v143_v34 = vmax.f32 %v140_v32, 0.0 }
 0x114   :  { %307 = vmatmul.mubr.f32.vlgmr.msra.gmra.mrb[0].mxu1 %v143_v34 }
 0x1e7   :  { %v233_v36 = vpop.f32.mrb[0].mxu1 }
 0x1e8   :  { %v234_v37 = vadd.f32 %v246_v35, %v233_v36  ;;  %v308_v38 = vpop.f32.mrb[1].mxu1 }
 0x1ea   :  { %237 = vst [vmem:[%s508_s5] sm:$0xff] %v234_v37 }
 0x1eb   :  { %242 = vsyncpa [#allocation3], 1 }
 0x1ec   :  { %243 = vsyncpa [#allocation5], 1 }

</bundles_post_ra>
